<compile_context>
chip_gen: v7x
topology: tpu7x:2x2x1
jax: 0.10.0
libtpu: 0.0.40
codegen_flags: <defaults>
</compile_context>

<pallas_src>
import functools

import jax
import jax.numpy as jnp
from jax import lax
from jax.experimental import pallas as pl
from jax.experimental.pallas import tpu as pltpu


def _neg_pearson_kernel(p_ref, t_ref, o_ref, *, batch, block_rows):
    # (TB, T) tile of each input; compute in f32 regardless of input dtype.
    p = p_ref[...].astype(jnp.float32)
    t = t_ref[...].astype(jnp.float32)
    tb, seq = p.shape
    n = jnp.float32(seq)

    # One-pass per-row Pearson (exactly the torch per-row formula): no centered
    # temporaries, so only the two casts plus the products are live in VMEM.
    sx = jnp.sum(p, axis=1, keepdims=True)            # (TB, 1)
    sy = jnp.sum(t, axis=1, keepdims=True)
    sxy = jnp.sum(p * t, axis=1, keepdims=True)
    sxx = jnp.sum(p * p, axis=1, keepdims=True)
    syy = jnp.sum(t * t, axis=1, keepdims=True)
    num = n * sxy - sx * sy
    den = (n * sxx - sx * sx) * (n * syy - sy * sy)
    pearson = num * lax.rsqrt(den)                    # EUP rsqrt, no divide

    # Mask rows past the end of the batch: with no host-side padding the
    # trailing partial block reads unspecified data.  Keep the select --
    # arithmetic masking (x * 0) would leak NaN/inf from garbage rows.
    row = (pl.program_id(0) * block_rows
           + lax.broadcasted_iota(jnp.int32, (tb, 1), 0))
    contrib = jnp.where(row < batch, 1.0 - pearson, 0.0)

    # One partial per grid step, replicated into a lane-dense (8,128) tile so
    # the store is an unmasked vst and blocks stay fully independent
    # ("parallel" batch axis -> shardable across v7x's two TensorCores).
    partial = jnp.sum(contrib)
    o_ref[...] = jnp.full(o_ref.shape, partial, dtype=jnp.float32)


def _sublane_pack(dtype):
    # Rows per packed sublane group: 8 for f32, 16 for bf16/f16, 32 for int8.
    return 8 * max(1, 4 // jnp.dtype(dtype).itemsize)


def _per_operand_budget_bytes():
    # f32 working-set budget per (TB, T) operand tile.  ~4 MiB keeps a pure
    # streaming kernel near the HBM roofline on v5e/v6e (128 MiB VMEM); on v7x
    # (64 MiB VMEM per TensorCore) stay at ~2 MiB so double-buffered inputs
    # plus the f32 temporaries remain comfortably under physical capacity.
    try:
        vmem = getattr(pltpu.get_tpu_info(), "vmem_capacity_bytes", None)
        if vmem is not None and vmem >= (96 << 20):
            return 4 << 20
    except Exception:
        pass
    return 2 << 20  # conservative default: safe on every generation


def _choose_block_rows(batch, seq, pack, budget_bytes):
    tb = max(pack, (budget_bytes // 4) // max(seq, 1))
    tb = min(tb, 2048)
    tb = max(pack, (tb // pack) * pack)
    if tb >= batch:
        # Whole batch fits one tile.  Still split into >= 2 blocks when the
        # sublane packing allows it so the "parallel" grid axis can be sharded
        # across v7x's two TensorCores (no effect on 1-TC v5e/v6e).
        if batch >= 2 * pack:
            half = -(-batch // 2)
            tb = -(-half // pack) * pack
        else:
            tb = batch
    return tb


def neg_pearson_loss(predictions, targets, *, block_rows=None, stream_bf16=False):
    """Negative Pearson loss; forward semantics identical to the torch module."""
    assert predictions.shape == targets.shape and predictions.ndim == 2
    batch, seq = predictions.shape

    if stream_bf16 and predictions.dtype == jnp.float32:
        # Opt-in (mainly for bandwidth-poor v5e): halves streamed HBM bytes;
        # compute still runs in f32 after the in-kernel cast (~1e-2 rel error).
        predictions = predictions.astype(jnp.bfloat16)
        targets = targets.astype(jnp.bfloat16)

    itemsize = jnp.dtype(predictions.dtype).itemsize
    pack = _sublane_pack(predictions.dtype)

    if block_rows is None:
        tb = _choose_block_rows(batch, seq, pack, _per_operand_budget_bytes())
    else:
        tb = batch if block_rows >= batch else max(pack, (block_rows // pack) * pack)

    num_blocks = pl.cdiv(batch, tb)
    # No host-side padding: a trailing partial block simply overhangs the batch
    # dim and its rows are masked in-kernel.  This avoids an extra full HBM
    # read+write pass over both inputs whenever batch % tb != 0.
    # TODO(synk): sequences so long that one (pack, T) f32 row-block exceeds the
    # VMEM budget would additionally need chunking over T with carried sums.

    tile_in_bytes = tb * seq * itemsize
    tile_f32_bytes = tb * seq * 4
    # 2 inputs x 2 pipeline buffers (streamed dtype) + ~5 tile-sized f32
    # temporaries (casts + products) + slack for outputs/internal scratch.
    vmem_limit = 2 * 2 * tile_in_bytes + 5 * tile_f32_bytes + (2 << 20)

    kernel = functools.partial(_neg_pearson_kernel, batch=batch, block_rows=tb)

    partials = pl.pallas_call(
        kernel,
        out_shape=jax.ShapeDtypeStruct((num_blocks, 8, 128), jnp.float32),
        grid=(num_blocks,),
        in_specs=[
            pl.BlockSpec((tb, seq), lambda i: (i, 0)),
            pl.BlockSpec((tb, seq), lambda i: (i, 0)),
            # If a trace ever shows exposed DMA at these tile sizes, add
            # pipeline_mode=pl.Buffered(3) here (last 2-5% knob, not needed now).
        ],
        out_specs=pl.BlockSpec((1, 8, 128), lambda i: (i, 0, 0)),
        compiler_params=pltpu.CompilerParams(
            dimension_semantics=("parallel",),
            vmem_limit_bytes=int(vmem_limit)),
    )(predictions, targets)

    return jnp.sum(partials[:, 0, 0]) / batch


def _neg_pearson_ref(predictions, targets):
    """Pure-JAX reference mirroring the torch code (unbiased global std)."""
    p = predictions.astype(jnp.float32)
    t = targets.astype(jnp.float32)
    n = p.size
    p = (p - jnp.mean(p)) / jnp.sqrt(jnp.sum((p - jnp.mean(p)) ** 2) / (n - 1))
    t = (t - jnp.mean(t)) / jnp.sqrt(jnp.sum((t - jnp.mean(t)) ** 2) / (n - 1))
    N = p.shape[1]
    sum_x = jnp.sum(p, axis=1)
    sum_y = jnp.sum(t, axis=1)
    sum_xy = jnp.sum(p * t, axis=1)
    sum_x2 = jnp.sum(p * p, axis=1)
    sum_y2 = jnp.sum(t * t, axis=1)
    pearson = (N * sum_xy - sum_x * sum_y) / jnp.sqrt(
        (N * sum_x2 - sum_x ** 2) * (N * sum_y2 - sum_y ** 2))
    return jnp.mean(1.0 - pearson)


if __name__ == "__main__":
    key = jax.random.PRNGKey(0)
    k1, k2, k3, k4 = jax.random.split(key, 4)

    # Case 1: small single-block case (B=4, T=128), auto block size.
    p1 = jax.random.normal(k1, (4, 128), dtype=jnp.float32)
    t1 = 0.7 * p1 + 0.3 * jax.random.normal(k2, (4, 128), dtype=jnp.float32)
    loss1 = neg_pearson_loss(p1, t1)
    jax.block_until_ready(loss1)
    ref1 = _neg_pearson_ref(p1, t1)
    assert jnp.allclose(loss1, ref1, atol=1e-4, rtol=1e-4), (loss1, ref1)

    # Case 2: multi-block grid with a trailing partial block (B=20 not a
    # multiple of 8) and NO host-side padding -> exercises the in-kernel mask
    # and the pipelined/parallel path.
    p2 = jax.random.normal(k3, (20, 256), dtype=jnp.float32)
    t2 = 0.5 * p2 + 0.5 * jax.random.normal(k4, (20, 256), dtype=jnp.float32)
    loss2 = neg_pearson_loss(p2, t2, block_rows=8)
    jax.block_until_ready(loss2)
    ref2 = _neg_pearson_ref(p2, t2)
    assert jnp.allclose(loss2, ref2, atol=1e-4, rtol=1e-4), (loss2, ref2)

    # Case 3: bf16 streaming path (sublane pack = 16); compute stays f32.
    p3 = p2.astype(jnp.bfloat16)
    t3 = t2.astype(jnp.bfloat16)
    loss3 = neg_pearson_loss(p3, t3)
    jax.block_until_ready(loss3)
    ref3 = _neg_pearson_ref(p3, t3)
    assert jnp.allclose(loss3, ref3, atol=1e-2, rtol=1e-2), (loss3, ref3)

    print("KERNEL_OK")
</pallas_src>

<mosaic_0001>
module attributes {stable_mosaic.version = 11 : i64} {
  func.func @_neg_pearson_kernel(%arg0: i32, %arg1: memref<4x128xf32, #tpu.memory_space<vmem>>, %arg2: memref<4x128xf32, #tpu.memory_space<vmem>>, %arg3: memref<1x8x128xf32, #tpu.memory_space<vmem>>) attributes {dimension_semantics = [#tpu.dimension_semantics<parallel>], iteration_bounds = array<i64: 1>, scalar_prefetch = 0 : i64, scratch_operands = 0 : i64, tpu.core_type = #tpu.core_type<tc>, window_params = [{transform_indices = @transform_0, window_bounds = array<i64: 4, 128>}, {transform_indices = @transform_1, window_bounds = array<i64: 4, 128>}, {transform_indices = @transform_2, window_bounds = array<i64: 1, 8, 128>}]} {
    %c0 = arith.constant 0 : index
    %c0_0 = arith.constant 0 : index
    %0 = vector.load %arg1[%c0, %c0_0] : memref<4x128xf32, #tpu.memory_space<vmem>>, vector<4x128xf32>
    %c0_1 = arith.constant 0 : index
    %c0_2 = arith.constant 0 : index
    %1 = vector.load %arg2[%c0_1, %c0_2] : memref<4x128xf32, #tpu.memory_space<vmem>>, vector<4x128xf32>
    %cst = arith.constant dense<0.000000e+00> : vector<4xf32>
    %2 = vector.multi_reduction <add>, %0, %cst [1] : vector<4x128xf32> to vector<4xf32>
    %3 = vector.shape_cast %2 : vector<4xf32> to vector<4x1xf32>
    %cst_3 = arith.constant dense<0.000000e+00> : vector<4xf32>
    %4 = vector.multi_reduction <add>, %1, %cst_3 [1] : vector<4x128xf32> to vector<4xf32>
    %5 = vector.shape_cast %4 : vector<4xf32> to vector<4x1xf32>
    %6 = arith.mulf %0, %1 : vector<4x128xf32>
    %cst_4 = arith.constant dense<0.000000e+00> : vector<4xf32>
    %7 = vector.multi_reduction <add>, %6, %cst_4 [1] : vector<4x128xf32> to vector<4xf32>
    %8 = vector.shape_cast %7 : vector<4xf32> to vector<4x1xf32>
    %9 = arith.mulf %0, %0 : vector<4x128xf32>
    %cst_5 = arith.constant dense<0.000000e+00> : vector<4xf32>
    %10 = vector.multi_reduction <add>, %9, %cst_5 [1] : vector<4x128xf32> to vector<4xf32>
    %11 = vector.shape_cast %10 : vector<4xf32> to vector<4x1xf32>
    %12 = arith.mulf %1, %1 : vector<4x128xf32>
    %cst_6 = arith.constant dense<0.000000e+00> : vector<4xf32>
    %13 = vector.multi_reduction <add>, %12, %cst_6 [1] : vector<4x128xf32> to vector<4xf32>
    %14 = vector.shape_cast %13 : vector<4xf32> to vector<4x1xf32>
    %cst_7 = arith.constant 1.280000e+02 : f32
    %15 = vector.broadcast %cst_7 : f32 to vector<4x1xf32>
    %16 = arith.mulf %15, %8 : vector<4x1xf32>
    %17 = arith.mulf %3, %5 : vector<4x1xf32>
    %18 = arith.subf %16, %17 : vector<4x1xf32>
    %cst_8 = arith.constant 1.280000e+02 : f32
    %19 = vector.broadcast %cst_8 : f32 to vector<4x1xf32>
    %20 = arith.mulf %19, %11 : vector<4x1xf32>
    %21 = arith.mulf %3, %3 : vector<4x1xf32>
    %22 = arith.subf %20, %21 : vector<4x1xf32>
    %cst_9 = arith.constant 1.280000e+02 : f32
    %23 = vector.broadcast %cst_9 : f32 to vector<4x1xf32>
    %24 = arith.mulf %23, %14 : vector<4x1xf32>
    %25 = arith.mulf %5, %5 : vector<4x1xf32>
    %26 = arith.subf %24, %25 : vector<4x1xf32>
    %27 = arith.mulf %22, %26 : vector<4x1xf32>
    %28 = math.rsqrt %27 : vector<4x1xf32>
    %29 = arith.mulf %18, %28 : vector<4x1xf32>
    %c4_i32 = arith.constant 4 : i32
    %30 = arith.muli %arg0, %c4_i32 : i32
    %31 = tpu.iota {dimensions = array<i32: 0>} : vector<4x1xi32>
    %32 = vector.broadcast %30 : i32 to vector<4x1xi32>
    %33 = arith.addi %32, %31 : vector<4x1xi32>
    %c4_i32_10 = arith.constant 4 : i32
    %34 = vector.broadcast %c4_i32_10 : i32 to vector<4x1xi32>
    %35 = arith.cmpi slt, %33, %34 : vector<4x1xi32>
    %cst_11 = arith.constant 1.000000e+00 : f32
    %36 = vector.broadcast %cst_11 : f32 to vector<4x1xf32>
    %37 = arith.subf %36, %29 : vector<4x1xf32>
    %cst_12 = arith.constant 0.000000e+00 : f32
    %38 = vector.broadcast %cst_12 : f32 to vector<4x1xf32>
    %39 = arith.select %35, %37, %38 : vector<4x1xi1>, vector<4x1xf32>
    %40 = vector.shape_cast %39 : vector<4x1xf32> to vector<1x4x1xf32>
    %cst_13 = arith.constant dense<0.000000e+00> : vector<1xf32>
    %41 = vector.multi_reduction <add>, %40, %cst_13 [1, 2] : vector<1x4x1xf32> to vector<1xf32>
    %42 = vector.shape_cast %41 : vector<1xf32> to vector<1x1x1xf32>
    %43 = vector.extract %42[0, 0, 0] : f32 from vector<1x1x1xf32>
    %44 = vector.broadcast %43 : f32 to vector<1x8x128xf32>
    %c0_14 = arith.constant 0 : index
    %c0_15 = arith.constant 0 : index
    %c0_16 = arith.constant 0 : index
    %45 = vector.load %arg3[%c0_14, %c0_15, %c0_16] : memref<1x8x128xf32, #tpu.memory_space<vmem>>, vector<1x8x128xf32>
    tpu.vector_store %arg3[%c0_14, %c0_15, %c0_16], %44 {strides = array<i32>} : memref<1x8x128xf32, #tpu.memory_space<vmem>>, vector<1x8x128xf32>,
    return
  }
  func.func @transform_0(%arg0: i32) -> (i32, i32) {
    %c0_i32 = arith.constant 0 : i32
    %c0_i32_0 = arith.constant 0 : i32
    return %arg0, %c0_i32 : i32, i32
  }
  func.func @transform_1(%arg0: i32) -> (i32, i32) {
    %c0_i32 = arith.constant 0 : i32
    %c0_i32_0 = arith.constant 0 : i32
    return %arg0, %c0_i32 : i32, i32
  }
  func.func @transform_2(%arg0: i32) -> (i32, i32, i32) {
    %c0_i32 = arith.constant 0 : i32
    %c0_i32_0 = arith.constant 0 : i32
    %c0_i32_1 = arith.constant 0 : i32
    return %arg0, %c0_i32, %c0_i32_0 : i32, i32, i32
  }
}

</mosaic_0001>

<bundles_post_ra>
// kernel: tpu_custom_call.1
= control target key start
LH: loop header
LB: loop body
LE: loop exit
PB: predicated region body
PF: predicated region fallthrough
CT: control target
= control target key end

     0   :  { %7 = vsyncpa [#allocation3], 0  ;;  %s239_s0 = inlined_call_operand.hbm [shape: f32[4,128], index: 0, kind: input, shape index: {}]   ;;  %s240_s1 = inlined_call_operand.hbm [shape: f32[4,128], index: 1, kind: input, shape index: {}]   ;;  %s241_s2 = inlined_call_operand.hbm [shape: f32[1,8,128], index: 2, kind: output, shape index: {}]  }
   0x1   :  { %8 = vsyncpa [#allocation6], 0 }
   0x2   :  { %9 = vsyncpa [#allocation4], 0  ;;  %s185_s9 = smov [#allocation2]   ;;  %s186_s11 = smov [#allocation5]  }
   0x3   :  { %s16_s10 = sshll.u32 %s185_s9, 4  ;;  %s26_s12 = sshll.u32 %s186_s11, 4  ;;  %s17_s10 = int_to_ptr.vmem [resolvable:$true] %s16_s10  ;;  %s27_s12 = int_to_ptr.vmem [resolvable:$true] %s26_s12 }
   0x4   :  { %s113_s15 = scalar_lea.hbm %s239_s0, 64 }
   0x5   :  { %p114_p0 = scmp.ne.s32.totalorder %s239_s0, %s113_s15  ;;  %p117_p1 = scmp.lt.u32.totalorder %s113_s15, %s239_s0 }
   0x7   :  { %p119_p2 = pnand %p117_p1, %p114_p0 }
   0x9   :  { %122 = shalt.err (!%p119_p2)
}
   0xa   :  { %s123_s20 = scalar_lea.vmem %s17_s10, 64  ;;  %p128_p4 = scmp.lt.s32.totalorder %s17_s10, %s17_s10 }
   0xb   :  { %p124_p3 = scmp.ne.s32.totalorder %s17_s10, %s123_s20  ;;  %p129_p5 = scmp.lt.s32.totalorder %s123_s20, %s123_s20 }
   0xd   :  { %p130_p6 = por %p129_p5, %p128_p4 }
   0xf   :  { %p131_p7 = pnand %p130_p6, %p124_p3 }
  0x11   :  { %134 = shalt.err (!%p131_p7)
}
  0x12   :  { %19 = dma.hbm_to_vmem [thread:$0]  %s239_s0, 64, %s17_s10, [#allocation3]  }
  0x13   :  { %s135_s25 = scalar_lea.hbm %s240_s1, 64 }
  0x14   :  { %p136_p8 = scmp.ne.s32.totalorder %s240_s1, %s135_s25  ;;  %p139_p9 = scmp.lt.u32.totalorder %s135_s25, %s240_s1 }
  0x16   :  { %p141_p10 = pnand %p139_p9, %p136_p8 }
  0x18   :  { %144 = shalt.err (!%p141_p10)
}
  0x19   :  { %s145_s30 = scalar_lea.vmem %s27_s12, 64  ;;  %p150_p12 = scmp.lt.s32.totalorder %s27_s12, %s27_s12 }
  0x1a   :  { %p146_p11 = scmp.ne.s32.totalorder %s27_s12, %s145_s30  ;;  %p151_p13 = scmp.lt.s32.totalorder %s145_s30, %s145_s30 }
  0x1c   :  { %p152_p0 = por %p151_p13, %p150_p12 }
  0x1e   :  { %p153_p1 = pnand %p152_p0, %p146_p11 }
  0x20   :  { %156 = shalt.err (!%p153_p1)
}
  0x21   :  { %29 = dma.hbm_to_vmem [thread:$0]  %s240_s1, 64, %s27_s12, [#allocation6]  }
  0x22   :  { %179 = dma.done.wait [#allocation3], 64  }
  0x23   :  { %180 = vsyncadd [#allocation3], 4294967232 }
  0x24   :  { %181 = dma.done.wait [#allocation6], 64  }
  0x25   :  { %182 = vsyncadd [#allocation6], 4294967232  ;;  %vm38_vm0 = vcmask 1043456   ;;  %v36_v0 = vld [vmem:[#allocation2] sm:$0xf]  ;;  %v70_v22 = vlaneseq  ;;  %vm77_vm2 = vcmask 3072  }
  0x26   :  { %v37_v1 = vld [vmem:[#allocation5] sm:$0xf]  ;;  %v39_v2 = vsel %vm38_vm0, %v36_v0, 0.0  ;;  %v49_v3 = vmul.f32 %v36_v0, %v36_v0  ;;  %s187_s1 = smov [#allocation7]  }
  0x27   :  { %v53_v4 = vmul.f32 %v37_v1, %v37_v1  ;;  %40 = vadd.xlane.f32.xlu0 %v39_v2  ;;  %v42_v6 = vsel %vm38_vm0, %v37_v1, 0.0  ;;  %v45_v7 = vmul.f32 %v37_v1, %v36_v0  ;;  %v71_v25 = vshrl.u32 %v70_v22, 7  ;;  %s96_s4 = sshll.u32 %s187_s1, 4  ;;  %s97_s4 = int_to_ptr.vmem [resolvable:$true] %s96_s4 }
  0x28   :  { %v50_v5 = vsel %vm38_vm0, %v49_v3, 0.0  ;;  %s157_s6 = scalar_lea.vmem %s97_s4, 128  ;;  %p162_p3 = scmp.lt.s32.totalorder %s97_s4, %s97_s4 }
  0x29   :  { %51 = vadd.xlane.f32.xlu1 %v50_v5  ;;  %v54_v8 = vsel %vm38_vm0, %v53_v4, 0.0  ;;  %v46_v9 = vsel %vm38_vm0, %v45_v7, 0.0  ;;  %vm74_vm1 = vcmp.lt.s32.totalorder %v71_v25, 4  ;;  %p158_p2 = scmp.ne.s32.totalorder %s97_s4, %s157_s6  ;;  %p163_p4 = scmp.lt.s32.totalorder %s157_s6, %s157_s6 }
  0x2b   :  { %43 = vadd.xlane.f32.xlu0 %v42_v6  ;;  %p164_p5 = por %p163_p4, %p162_p3 }
  0x2d   :  { %55 = vadd.xlane.f32.xlu1 %v54_v8  ;;  %p165_p6 = pnand %p164_p5, %p158_p2 }
  0x2f   :  { %47 = vadd.xlane.f32.xlu0 %v46_v9 }
  0xb4   :  { %v41_v10 = vpop.xlane.xlu0 %40 }
  0xb5   :  { %v61_v13 = vmul.f32 %v41_v10, %v41_v10 }
  0xb6   :  { %v52_v11 = vpop.xlane.xlu1 %51 }
  0xb7   :  { %v60_v14 = vmul.f32 128.0, %v52_v11 }
  0xb8   :  { %v44_v12 = vpop.xlane.xlu0 %43 }
  0xb9   :  { %v64_v15 = vmul.f32 %v44_v12, %v44_v12  ;;  %v62_v18 = vsub.f32 %v60_v14, %v61_v13  ;;  %v58_v24 = vmul.f32 %v44_v12, %v41_v10 }
  0xba   :  { %v56_v16 = vpop.xlane.xlu1 %55 }
  0xbb   :  { %v63_v17 = vmul.f32 128.0, %v56_v16 }
  0xbc   :  { %v48_v21 = vpop.xlane.xlu0 %47 }
  0xbd   :  { %v65_v19 = vsub.f32 %v63_v17, %v64_v15  ;;  %v57_v23 = vmul.f32 128.0, %v48_v21 }
  0xbf   :  { %v66_v20 = vmul.f32 %v65_v19, %v62_v18  ;;  %v59_v26 = vsub.f32 %v57_v23, %v58_v24 }
  0xc1   :  { %111 = vrsqrt.f32 %v66_v20 }
  0xcb   :  { %v112_v27 = vpop.eup %111 }
  0xcc   :  { %v68_v28 = vmul.f32 %v112_v27, %v59_v26 }
  0xce   :  { %v75_v29 = vsub.f32 1.0, %v68_v28 }
  0xd0   :  { %v76_v30 = vsel %vm74_vm1, %v75_v29, 0.0 }
  0xd1   :  { %v78_v31 = vsel %vm77_vm2, %v76_v30, 0.0 }
  0xd2   :  { %79 = vadd.xlane.f32.xlu1 %v78_v31 }
 0x15f   :  { %v80_v32 = vpop.xlane.xlu1 %79 }
 0x160   :  { %v81_v33 = vrot.slane %v80_v32, 4 }
 0x162   :  { %v82_v34 = vadd.f32 %v81_v33, %v80_v32 }
 0x164   :  { %v83_v35 = vrot.slane %v82_v34, 2 }
 0x166   :  { %v84_v36 = vadd.f32 %v83_v35, %v82_v34 }
 0x168   :  { %v85_v37 = vrot.slane %v84_v36, 1 }
 0x16a   :  { %v86_v38 = vadd.f32 %v85_v37, %v84_v36 }
 0x16c   :  { %106 = vpush %v86_v38 }
 0x19d   :  { %s107_s5 = spop %106 }
 0x19e   :  { %v88_v39 = vstv %s107_s5 }
 0x19f   :  { %89 = vst [vmem:[#allocation7] sm:$0xff] %v88_v39 }
 0x1a0   :  { %168 = shalt.err (!%p165_p6)
}
 0x1a1   :  { %s169_s9 = scalar_lea.hbm %s241_s2, 128 }
 0x1a2   :  { %p170_p7 = scmp.ne.s32.totalorder %s241_s2, %s169_s9  ;;  %p173_p8 = scmp.lt.u32.totalorder %s169_s9, %s241_s2 }
 0x1a4   :  { %p175_p9 = pnand %p173_p8, %p170_p7 }
 0x1a6   :  { %178 = shalt.err (!%p175_p9)
}
 0x1a7   :  { %99 = dma.vmem_to_hbm [thread:$0]  %s97_s4, 128, %s241_s2, [#allocation4]  }
 0x1a8   :  { %183 = dma.done.wait [#allocation4], 128  }
 0x1a9   :  { %184 = vsyncadd [#allocation4], 4294967168 }
 0x1aa   :  { %103 = vsyncpa [#allocation3], 1 }
 0x1ab   :  { %104 = vsyncpa [#allocation6], 1 }
 0x1ac   :  { %105 = vsyncpa [#allocation4], 1 }

</bundles_post_ra>
